<compile_context>
chip_gen: v7x
topology: tpu7x:2x2x1
jax: 0.10.0
libtpu: 0.0.40
codegen_flags: <defaults>
</compile_context>

<pallas_src>
import functools

import jax
import jax.numpy as jnp
from jax.experimental import pallas as pl
from jax.experimental.pallas import tpu as pltpu


def update_kernel(h_ref, m_ref, w1_ref, b1_ref, w2_ref, b2_ref, out_ref):
    # Build the concatenated [tb, 2H] slab in VMEM (concat along the lane
    # axis), then a single K=2H matmul on the MXU.
    mix = jnp.concatenate([h_ref[...], m_ref[...]], axis=-1)
    z = jnp.dot(mix, w1_ref[...], preferred_element_type=jnp.float32) + b1_ref[...]
    z = jnp.maximum(z, 0.0)  # ReLU
    y = (
        jnp.dot(z.astype(w2_ref.dtype), w2_ref[...],
                preferred_element_type=jnp.float32)
        + b2_ref[...]
    )
    out_ref[...] = y.astype(out_ref.dtype)


def update_forward(h, msg, w1, b1, w2, b2, *, block_rows=1024):
    """h, msg: [B, H]; w1: [2H, H] (pre-transposed, i.e. W1.T); b1: [H];
    w2: [H, H] (W2.T); b2: [H]. Returns the new node.h, [B, H], written
    in place over the `h` buffer (aliased)."""
    B, H = h.shape
    assert msg.shape == (B, H)
    assert w1.shape == (2 * H, H) and w2.shape == (H, H)

    # Batch tile: whole array if small, otherwise a pipelined 1024-row tile.
    tb = B if B <= block_rows else block_rows
    grid = (pl.cdiv(B, tb),)

    b1_2d = b1.reshape(1, H)
    b2_2d = b2.reshape(1, H)

    batch_spec = pl.BlockSpec((tb, H), lambda i: (i, 0))
    resident = lambda shape: pl.BlockSpec(shape, lambda i: (0,) * len(shape))

    return pl.pallas_call(
        update_kernel,
        out_shape=jax.ShapeDtypeStruct((B, H), h.dtype),
        grid=grid,
        in_specs=[
            batch_spec,               # h   (tiled over batch)
            batch_spec,               # msg (tiled over batch)
            resident((2 * H, H)),     # w1  (resident)
            resident((1, H)),         # b1  (resident)
            resident((H, H)),         # w2  (resident)
            resident((1, H)),         # b2  (resident)
        ],
        out_specs=batch_spec,
        input_output_aliases={0: 0},  # node.h is overwritten in place
        compiler_params=pltpu.CompilerParams(
            dimension_semantics=("parallel",),
        ),
    )(h, msg, w1, b1_2d, w2, b2_2d)


def _torch_linear_init(key, fan_in, fan_out, dtype=jnp.float32):
    """Deterministic init matching nn.Linear's U(-1/sqrt(fan_in), 1/sqrt(fan_in)).
    Returns weight already transposed to [fan_in, fan_out] and bias [fan_out]."""
    kw, kb = jax.random.split(key)
    bound = 1.0 / jnp.sqrt(fan_in)
    w_t = jax.random.uniform(kw, (fan_in, fan_out), dtype, -bound, bound)
    b = jax.random.uniform(kb, (fan_out,), dtype, -bound, bound)
    return w_t, b


if __name__ == "__main__":
    hsize = 64    # module default (hsize=64); 2H = 128 -> lane-dense first matmul
    batch = 256   # small node set; exercises a 2-step pipelined batch grid below

    root = jax.random.PRNGKey(0)
    k_h, k_msg, k_l1, k_l2 = jax.random.split(root, 4)

    # node.h and node.msg (both [B, hsize], as implied by cat along dim=1).
    h = jax.random.normal(k_h, (batch, hsize), jnp.float32)
    msg = jax.random.normal(k_msg, (batch, hsize), jnp.float32)

    # h_out = Linear(2*hsize, hsize) -> ReLU -> Linear(hsize, hsize)
    w1, b1 = _torch_linear_init(k_l1, 2 * hsize, hsize)   # [2H, H] (== W1.T)
    w2, b2 = _torch_linear_init(k_l2, hsize, hsize)       # [H, H]  (== W2.T)

    # Pure-JAX reference, computed BEFORE the kernel call (the kernel donates
    # and overwrites the `h` buffer, matching `node.h = self.h_out(mix)`).
    mix = jnp.concatenate([h, msg], axis=1)
    ref = jnp.maximum(mix @ w1 + b1, 0.0) @ w2 + b2

    run = jax.jit(functools.partial(update_forward, block_rows=128),
                  donate_argnums=(0,))
    out = jax.block_until_ready(run(h, msg, w1, b1, w2, b2))

    assert out.shape == (batch, hsize)
    assert jnp.allclose(out, ref, atol=1e-4, rtol=1e-4), "mismatch vs reference"
    print("KERNEL_OK")
</pallas_src>

<mosaic_0001>
module attributes {stable_mosaic.version = 11 : i64} {
  func.func @update_kernel(%arg0: i32, %arg1: memref<128x64xf32, #tpu.memory_space<vmem>>, %arg2: memref<128x64xf32, #tpu.memory_space<vmem>>, %arg3: memref<128x64xf32, #tpu.memory_space<vmem>>, %arg4: memref<1x64xf32, #tpu.memory_space<vmem>>, %arg5: memref<64x64xf32, #tpu.memory_space<vmem>>, %arg6: memref<1x64xf32, #tpu.memory_space<vmem>>, %arg7: memref<128x64xf32, #tpu.memory_space<vmem>>) attributes {dimension_semantics = [#tpu.dimension_semantics<parallel>], iteration_bounds = array<i64: 2>, scalar_prefetch = 0 : i64, scratch_operands = 0 : i64, tpu.core_type = #tpu.core_type<tc>, window_params = [{transform_indices = @transform_0, window_bounds = array<i64: 128, 64>}, {transform_indices = @transform_1, window_bounds = array<i64: 128, 64>}, {pipeline_mode = #tpu.pipeline_mode<synchronous>, transform_indices = @transform_2, window_bounds = array<i64: 128, 64>}, {pipeline_mode = #tpu.pipeline_mode<synchronous>, transform_indices = @transform_3, window_bounds = array<i64: 1, 64>}, {pipeline_mode = #tpu.pipeline_mode<synchronous>, transform_indices = @transform_4, window_bounds = array<i64: 64, 64>}, {pipeline_mode = #tpu.pipeline_mode<synchronous>, transform_indices = @transform_5, window_bounds = array<i64: 1, 64>}, {transform_indices = @transform_6, window_bounds = array<i64: 128, 64>}]} {
    %c0 = arith.constant 0 : index
    %c0_0 = arith.constant 0 : index
    %0 = vector.load %arg1[%c0, %c0_0] : memref<128x64xf32, #tpu.memory_space<vmem>>, vector<128x64xf32>
    %c0_1 = arith.constant 0 : index
    %c0_2 = arith.constant 0 : index
    %1 = vector.load %arg2[%c0_1, %c0_2] : memref<128x64xf32, #tpu.memory_space<vmem>>, vector<128x64xf32>
    %2 = tpu.concatenate %0, %1 in 1 : vector<128x64xf32>, vector<128x64xf32> -> vector<128x128xf32>
    %c0_3 = arith.constant 0 : index
    %c0_4 = arith.constant 0 : index
    %3 = vector.load %arg3[%c0_3, %c0_4] : memref<128x64xf32, #tpu.memory_space<vmem>>, vector<128x64xf32>
    %cst = arith.constant dense<0.000000e+00> : vector<128x64xf32>
    %4 = tpu.matmul %2, %3, %cst {dimension_numbers = #tpu.dot_dimension_numbers<[1], [0], [0], [1], [0, 0, 1, 1], [], []>} : vector<128x128xf32>, vector<128x64xf32>, vector<128x64xf32> -> vector<128x64xf32>
    %c0_5 = arith.constant 0 : index
    %c0_6 = arith.constant 0 : index
    %5 = vector.load %arg4[%c0_5, %c0_6] : memref<1x64xf32, #tpu.memory_space<vmem>>, vector<1x64xf32>
    %6 = vector.broadcast %5 : vector<1x64xf32> to vector<128x64xf32>
    %7 = arith.addf %4, %6 : vector<128x64xf32>
    %cst_7 = arith.constant 0.000000e+00 : f32
    %8 = vector.broadcast %cst_7 : f32 to vector<128x64xf32>
    %9 = arith.maximumf %7, %8 : vector<128x64xf32>
    %c0_8 = arith.constant 0 : index
    %c0_9 = arith.constant 0 : index
    %10 = vector.load %arg5[%c0_8, %c0_9] : memref<64x64xf32, #tpu.memory_space<vmem>>, vector<64x64xf32>
    %cst_10 = arith.constant dense<0.000000e+00> : vector<128x64xf32>
    %11 = tpu.matmul %9, %10, %cst_10 {dimension_numbers = #tpu.dot_dimension_numbers<[1], [0], [0], [1], [0, 0, 1, 1], [], []>} : vector<128x64xf32>, vector<64x64xf32>, vector<128x64xf32> -> vector<128x64xf32>
    %c0_11 = arith.constant 0 : index
    %c0_12 = arith.constant 0 : index
    %12 = vector.load %arg6[%c0_11, %c0_12] : memref<1x64xf32, #tpu.memory_space<vmem>>, vector<1x64xf32>
    %13 = vector.broadcast %12 : vector<1x64xf32> to vector<128x64xf32>
    %14 = arith.addf %11, %13 : vector<128x64xf32>
    %c0_13 = arith.constant 0 : index
    %c0_14 = arith.constant 0 : index
    %15 = vector.load %arg7[%c0_13, %c0_14] : memref<128x64xf32, #tpu.memory_space<vmem>>, vector<128x64xf32>
    tpu.vector_store %arg7[%c0_13, %c0_14], %14 {strides = array<i32>} : memref<128x64xf32, #tpu.memory_space<vmem>>, vector<128x64xf32>,
    return
  }
  func.func @transform_0(%arg0: i32) -> (i32, i32) {
    %c0_i32 = arith.constant 0 : i32
    %c0_i32_0 = arith.constant 0 : i32
    return %arg0, %c0_i32 : i32, i32
  }
  func.func @transform_1(%arg0: i32) -> (i32, i32) {
    %c0_i32 = arith.constant 0 : i32
    %c0_i32_0 = arith.constant 0 : i32
    return %arg0, %c0_i32 : i32, i32
  }
  func.func @transform_2(%arg0: i32) -> (i32, i32) {
    %c0_i32 = arith.constant 0 : i32
    %c0_i32_0 = arith.constant 0 : i32
    %c0_i32_1 = arith.constant 0 : i32
    return %c0_i32, %c0_i32_0 : i32, i32
  }
  func.func @transform_3(%arg0: i32) -> (i32, i32) {
    %c0_i32 = arith.constant 0 : i32
    %c0_i32_0 = arith.constant 0 : i32
    %c0_i32_1 = arith.constant 0 : i32
    return %c0_i32, %c0_i32_0 : i32, i32
  }
  func.func @transform_4(%arg0: i32) -> (i32, i32) {
    %c0_i32 = arith.constant 0 : i32
    %c0_i32_0 = arith.constant 0 : i32
    %c0_i32_1 = arith.constant 0 : i32
    return %c0_i32, %c0_i32_0 : i32, i32
  }
  func.func @transform_5(%arg0: i32) -> (i32, i32) {
    %c0_i32 = arith.constant 0 : i32
    %c0_i32_0 = arith.constant 0 : i32
    %c0_i32_1 = arith.constant 0 : i32
    return %c0_i32, %c0_i32_0 : i32, i32
  }
  func.func @transform_6(%arg0: i32) -> (i32, i32) {
    %c0_i32 = arith.constant 0 : i32
    %c0_i32_0 = arith.constant 0 : i32
    return %arg0, %c0_i32 : i32, i32
  }
}

</mosaic_0001>

<bundles_post_ra>
// kernel: update_forward.1
= control target key start
LH: loop header
LB: loop body
LE: loop exit
PB: predicated region body
PF: predicated region fallthrough
CT: control target
= control target key end

     0   :  { %s1190_s21 = smov 0   ;;  %s1403_s0 = inlined_call_operand.vmem [shape: f32[256,64], index: 0, kind: input, shape index: {}, may-alias: {0,6}]   ;;  %s1404_s1 = inlined_call_operand.vmem [shape: f32[256,64], index: 1, kind: input, shape index: {}]   ;;  %s1405_s2 = inlined_call_operand.vmem [shape: f32[128,64], index: 2, kind: input, shape index: {}]   ;;  %s1406_s3 = inlined_call_operand.vmem [shape: f32[1,64], index: 3, kind: input, shape index: {}]   ;;  %s1407_s4 = inlined_call_operand.vmem [shape: f32[64,64], index: 4, kind: input, shape index: {}]   ;;  %s1408_s5 = inlined_call_operand.vmem [shape: f32[1,64], index: 5, kind: input, shape index: {}]   ;;  %s1409_s6 = inlined_call_operand.vmem [shape: f32[256,64], index: 6, kind: output, shape index: {}, may-alias: {0,6}]  }
   0x1 LB: > { %s866_s22 = sadd.s32 4294967295, %s1152_s21   ;;  %p870_p0 = scmp.ge.s32.totalorder %s1152_s21, 1  ;;  %s1152_s21 = sphi %s1190_s21, %s16_s21  }
   0x2   : > { %p224_p1 = scmp.lt.s32.totalorder %s1152_s21, 3 }
   0x4   : > { %p225_p2 = pnand %p870_p0, %p224_p1 }
   0x5   : > { %s871_s23 = sshll.u32 (!%p225_p2), %s866_s22, 4  ;;  %v390_v0 = vld [vmem:[%s1405_s2] sm:$0xff] (!%p225_p2)  ;;  %v391_v1 = vld [vmem:[%s1405_s2 + $0x8] sm:$0xff] (!%p225_p2)  ;;  %v392_v2 = vld [vmem:[%s1405_s2 + $0x10] sm:$0xff] (!%p225_p2)  ;;  %s1154_s20 = smov (!%p225_p2), 64   ;;  %vm373_vm0 = vcmask (!%p225_p2), 523264  }
   0x6   : > { %228 = sbr.rel (%p225_p2) target bundleno = 600 (0x258), region = 44  ;;  %p260_p3 = scmp.lt.s32.totalorder (!%p225_p2), %s871_s23, 31  ;;  %v1049_v3 = vpack.c.bf16 (!%p225_p2), %v391_v1, %v390_v0  ;;  %v393_v4 = vld [vmem:[%s1405_s2 + $0x18] sm:$0xff] (!%p225_p2)  ;;  %v394_v6 = vld [vmem:[%s1405_s2 + $0x20] sm:$0xff] (!%p225_p2)  ;;  %v395_v7 = vld [vmem:[%s1405_s2 + $0x28] sm:$0xff] (!%p225_p2) }
   0x7   : > { %v1053_v5 = vpack.c.bf16 (!%p225_p2), %v393_v4, %v392_v2  ;;  %v1057_v8 = vpack.c.bf16 (!%p225_p2), %v395_v7, %v394_v6  ;;  %v396_v9 = vld [vmem:[%s1405_s2 + $0x30] sm:$0xff] (!%p225_p2)  ;;  %v397_v10 = vld [vmem:[%s1405_s2 + $0x38] sm:$0xff] (!%p225_p2)  ;;  %v398_v23 = vld [vmem:[%s1405_s2 + $0x40] sm:$0xff] (!%p225_p2) }
   0x8   : > { %1050 = vmatprep.subr.bf16.mxu0 (!%p225_p2), %v1049_v3  ;;  %v1061_v21 = vpack.c.bf16 (!%p225_p2), %v397_v10, %v396_v9  ;;  %v399_v24 = vld [vmem:[%s1405_s2 + $0x48] sm:$0xff] (!%p225_p2)  ;;  %v400_v32 = vld [vmem:[%s1405_s2 + $0x50] sm:$0xff] (!%p225_p2)  ;;  %v401_v33 = vld [vmem:[%s1405_s2 + $0x58] sm:$0xff] (!%p225_p2) }
   0x9   : > { %1052 = vmatpush3.bf16.msra.mxu0 (!%p225_p2), %v1049_v3  ;;  %v1065_v30 = vpack.c.bf16 (!%p225_p2), %v399_v24, %v398_v23  ;;  %v1069_v39 = vpack.c.bf16 (!%p225_p2), %v401_v33, %v400_v32  ;;  %v402_v41 = vld [vmem:[%s1405_s2 + $0x60] sm:$0xff] (!%p225_p2)  ;;  %v403_v42 = vld [vmem:[%s1405_s2 + $0x68] sm:$0xff] (!%p225_p2)  ;;  %v404_v45 = vld [vmem:[%s1405_s2 + $0x70] sm:$0xff] (!%p225_p2) }
   0xa   : > { %1054 = vmatprep.subr.bf16.mxu0 (!%p225_p2), %v1053_v5  ;;  %v1073_v44 = vpack.c.bf16 (!%p225_p2), %v403_v42, %v402_v41  ;;  %v405_v46 = vld [vmem:[%s1405_s2 + $0x78] sm:$0xff] (!%p225_p2)  ;;  %v574_v48 = vld [vmem:[%s1407_s4] sm:$0xff] (!%p225_p2)  ;;  %v575_v49 = vld [vmem:[%s1407_s4 + $0x8] sm:$0xff] (!%p225_p2) }
   0xb   : > { %v1077_v47 = vpack.c.bf16 (!%p225_p2), %v405_v46, %v404_v45  ;;  %v576_v50 = vld [vmem:[%s1407_s4 + $0x10] sm:$0xff] (!%p225_p2)  ;;  %v1081_v51 = vpack.c.bf16 (!%p225_p2), %v575_v49, %v574_v48  ;;  %v577_v52 = vld [vmem:[%s1407_s4 + $0x18] sm:$0xff] (!%p225_p2)  ;;  %v578_v54 = vld [vmem:[%s1407_s4 + $0x20] sm:$0xff] (!%p225_p2) }
   0xc   : > { %v1085_v53 = vpack.c.bf16 (!%p225_p2), %v577_v52, %v576_v50  ;;  %v579_v55 = vld [vmem:[%s1407_s4 + $0x28] sm:$0xff] (!%p225_p2)  ;;  %v580_v49 = vld [vmem:[%s1407_s4 + $0x30] sm:$0xff] (!%p225_p2)  ;;  %v581_v50 = vld [vmem:[%s1407_s4 + $0x38] sm:$0xff] (!%p225_p2) }
   0xd   : > { %s1411_s23 = smov (!%p260_p3, %s871_s23), 31  ;;  %1056 = vmatpush3.bf16.msra.mxu0 %v1053_v5  ;;  %1082 = vmatprep.subr.bf16.mxu1 %v1081_v51  ;;  %v1089_v56 = vpack.c.bf16 %v579_v55, %v578_v54  ;;  %v877_v52 = vld [vmem:[%s1406_s3] ss:$0 sm:$0xff] }
   0xe   : > { %s1216_s12 = sshll.u32 %s1411_s23, 3  ;;  %1058 = vmatprep.subr.bf16.mxu0 %v1057_v8  ;;  %1084 = vmatpush3.bf16.msra.mxu1 %v1081_v51  ;;  %v1093_v51 = vpack.c.bf16 %v581_v50, %v580_v49 }
   0xf   : > { %s1222_s15 = scalar_lea.vmem %s1404_s1, %s1216_s12  ;;  %1086 = vmatprep.subr.bf16.mxu1 %v1085_v53  ;;  %s1300_s30 = scalar_lea.vmem %s1403_s0, %s1216_s12 }
  0x10   : > { %v293_v11 = vld [vmem:[%s1222_s15] sm:$0xff]  ;;  %v294_v12 = vld [vmem:[%s1222_s15 + $0x8] sm:$0xff]  ;;  %v295_v13 = vld [vmem:[%s1222_s15 + $0x10] sm:$0xff]  ;;  %s1366_s18 = scalar_lea.vmem %s1409_s6, %s1216_s12 }
  0x11   : > { %v1106_v14 = vpack.i.bf16 %v294_v12, %v293_v11  ;;  %v296_v15 = vld [vmem:[%s1222_s15 + $0x18] sm:$0xff]  ;;  %v297_v16 = vld [vmem:[%s1222_s15 + $0x20] sm:$0xff]  ;;  %v298_v17 = vld [vmem:[%s1222_s15 + $0x28] sm:$0xff]  ;;  %1060 = vmatpush3.bf16.msra.mxu0 %v1057_v8 }
  0x12   : > { %v1116_v18 = vpack.i.bf16 %v298_v17, %v297_v16  ;;  %v299_v19 = vld [vmem:[%s1222_s15 + $0x30] sm:$0xff]  ;;  %v300_v20 = vld [vmem:[%s1222_s15 + $0x38] sm:$0xff]  ;;  %v1111_v22 = vpack.i.bf16 %v296_v15, %v295_v13  ;;  %v301_v26 = vld [vmem:[%s1222_s15 + $0x40] sm:$0xff]  ;;  %1062 = vmatprep.subr.bf16.mxu0 %v1061_v21  ;;  %1088 = vmatpush3.bf16.msra.mxu1 %v1085_v53 }
  0x13   : > { %1107 = vrot.lane.b32.xlu0 %v1106_v14, %s1154_s20  ;;  %v1121_v25 = vpack.i.bf16 %v300_v20, %v299_v19  ;;  %v302_v27 = vld [vmem:[%s1222_s15 + $0x48] sm:$0xff]  ;;  %v303_v28 = vld [vmem:[%s1222_s15 + $0x50] sm:$0xff]  ;;  %v304_v29 = vld [vmem:[%s1222_s15 + $0x58] sm:$0xff]  ;;  %1090 = vmatprep.subr.bf16.mxu1 %v1089_v56 }
  0x14   : > { %1117 = vrot.lane.b32.xlu1 %v1116_v18, %s1154_s20  ;;  %v1126_v31 = vpack.i.bf16 %v302_v27, %v301_v26  ;;  %v1131_v34 = vpack.i.bf16 %v304_v29, %v303_v28  ;;  %v305_v35 = vld [vmem:[%s1222_s15 + $0x60] sm:$0xff]  ;;  %v306_v36 = vld [vmem:[%s1222_s15 + $0x68] sm:$0xff]  ;;  %v307_v37 = vld [vmem:[%s1222_s15 + $0x70] sm:$0xff] }
  0x15   : > { %v308_v38 = vld [vmem:[%s1222_s15 + $0x78] sm:$0xff]  ;;  %1064 = vmatpush3.bf16.msra.mxu0 %v1061_v21  ;;  %v1136_v40 = vpack.i.bf16 %v306_v36, %v305_v35  ;;  %v277_v58 = vld [vmem:[%s1300_s30] sm:$0xff]  ;;  %v278_v59 = vld [vmem:[%s1300_s30 + $0x8] sm:$0xff] }
  0x16   : > { %1066 = vmatprep.subr.bf16.mxu0 %v1065_v30  ;;  %v1141_v43 = vpack.i.bf16 %v308_v38, %v307_v37  ;;  %1092 = vmatpush3.bf16.msra.mxu1 %v1089_v56  ;;  %v279_v3 = vld [vmem:[%s1300_s30 + $0x10] sm:$0xff]  ;;  %v280_v4 = vld [vmem:[%s1300_s30 + $0x18] sm:$0xff]  ;;  %v281_v5 = vld [vmem:[%s1300_s30 + $0x20] sm:$0xff] }
  0x17   : > { %1112 = vrot.lane.b32.xlu0 %v1111_v22, %s1154_s20  ;;  %v282_v14 = vld [vmem:[%s1300_s30 + $0x28] sm:$0xff]  ;;  %v283_v16 = vld [vmem:[%s1300_s30 + $0x30] sm:$0xff]  ;;  %v284_v21 = vld [vmem:[%s1300_s30 + $0x38] sm:$0xff]  ;;  %1094 = vmatprep.subr.bf16.mxu1 %v1093_v51 }
  0x18   : > { %1122 = vrot.lane.b32.xlu1 %v1121_v25, %s1154_s20  ;;  %v285_v23 = vld [vmem:[%s1300_s30 + $0x40] sm:$0xff]  ;;  %v286_v28 = vld [vmem:[%s1300_s30 + $0x48] sm:$0xff]  ;;  %v288_v35 = vld [vmem:[%s1300_s30 + $0x58] sm:$0xff] }
  0x19   : > { %1068 = vmatpush3.bf16.msra.mxu0 %v1065_v30  ;;  %v287_v30 = vld [vmem:[%s1300_s30 + $0x50] sm:$0xff]  ;;  %v289_v37 = vld [vmem:[%s1300_s30 + $0x60] sm:$0xff]  ;;  %v290_v42 = vld [vmem:[%s1300_s30 + $0x68] sm:$0xff] }
  0x1a   : > { %1070 = vmatprep.subr.bf16.mxu0 %v1069_v39  ;;  %1096 = vmatpush3.bf16.msra.mxu1 %v1093_v51 }
  0x1b   : > { %1127 = vrot.lane.b32.xlu0 %v1126_v31, %s1154_s20 }
  0x1c   : > { %1132 = vrot.lane.b32.xlu1 %v1131_v34, %s1154_s20 }
  0x1d   : > { %1072 = vmatpush3.bf16.msra.mxu0 %v1069_v39 }
  0x1e   : > { %1074 = vmatprep.subr.bf16.mxu0 %v1073_v44 }
  0x1f   : > { %1137 = vrot.lane.b32.xlu0 %v1136_v40, %s1154_s20 }
  0x20   : > { %1142 = vrot.lane.b32.xlu1 %v1141_v43, %s1154_s20  ;;  %v291_v43 = vld [vmem:[%s1300_s30 + $0x70] sm:$0xff] }
  0x21   : > { %1076 = vmatpush3.bf16.msra.mxu0 %v1073_v44 }
  0x22   : > { %1078 = vmatprep.subr.bf16.mxu0 %v1077_v47 }
  0x25   : > { %1080 = vmatpush3.bf16.msra.mxu0 %v1077_v47  ;;  %v292_v47 = vld [vmem:[%s1300_s30 + $0x78] sm:$0xff] }
  0x85   : > { %v1108_v57 = vpop.permute.xlu0 %1107 }
  0x86   : > { %v1110_v60 = vunpack.i.h.bf16 %v1108_v57  ;;  %v1109_v61 = vunpack.i.l.bf16 %v1108_v57  ;;  %v1118_v62 = vpop.permute.xlu1 %1117 }
  0x87   : > { %v1119_v1 = vunpack.i.l.bf16 %v1118_v62  ;;  %v1120_v9 = vunpack.i.h.bf16 %v1118_v62 }
  0x88   : > { %v374_v63 = vsel %vm373_vm0, %v277_v58, %v1109_v61  ;;  %v375_v0 = vsel %vm373_vm0, %v278_v59, %v1110_v60 }
  0x89   : > { %v1113_v2 = vpop.permute.xlu0 %1112  ;;  %985 = vmatprep.mubr.f32.mxu0 %v374_v63  ;;  %v378_v13 = vsel %vm373_vm0, %v281_v5, %v1119_v1  ;;  %v379_v18 = vsel %vm373_vm0, %v282_v14, %v1120_v9 }
  0x8a   : > { %v1115_v6 = vunpack.i.h.bf16 %v1113_v2  ;;  %v1114_v7 = vunpack.i.l.bf16 %v1113_v2  ;;  %986 = vmatmul.mubr.f32.vlgmr.msra.gmra.mrb[0].mxu0 %v375_v0  ;;  %v1123_v8 = vpop.permute.xlu1 %1122 }
  0x8b   : > { %v1124_v12 = vunpack.i.l.bf16 %v1123_v8  ;;  %v1125_v17 = vunpack.i.h.bf16 %v1123_v8 }
  0x8c   : > { %v376_v10 = vsel %vm373_vm0, %v279_v3, %v1114_v7  ;;  %v377_v11 = vsel %vm373_vm0, %v280_v4, %v1115_v6 }
  0x8d   : > { %988 = vmatprep.mubr.f32.mxu0 %v376_v10  ;;  %v1128_v15 = vpop.permute.xlu0 %1127  ;;  %v380_v20 = vsel %vm373_vm0, %v283_v16, %v1124_v12  ;;  %v381_v25 = vsel %vm373_vm0, %v284_v21, %v1125_v17 }
  0x8e   : > { %989 = vmatmul.mubr.f32.gmra.mrb[2].mxu0 %v377_v11  ;;  %v1129_v19 = vunpack.i.l.bf16 %v1128_v15  ;;  %v1133_v22 = vpop.permute.xlu1 %1132  ;;  %v1130_v24 = vunpack.i.h.bf16 %v1128_v15 }
  0x8f   : > { %991 = vmatprep.mubr.f32.mxu0 %v378_v13  ;;  %v1134_v26 = vunpack.i.l.bf16 %v1133_v22  ;;  %v1135_v31 = vunpack.i.h.bf16 %v1133_v22 }
  0x90   : > { %v382_v27 = vsel %vm373_vm0, %v285_v23, %v1129_v19  ;;  %v383_v32 = vsel %vm373_vm0, %v286_v28, %v1130_v24 }
  0x91   : > { %v1138_v29 = vpop.permute.xlu0 %1137  ;;  %v384_v34 = vsel %vm373_vm0, %v287_v30, %v1134_v26  ;;  %v385_v39 = vsel %vm373_vm0, %v288_v35, %v1135_v31 }
  0x92   : > { %992 = vmatmul.mubr.f32.gmra.mrb[4].mxu0 %v379_v18  ;;  %v1139_v33 = vunpack.i.l.bf16 %v1138_v29  ;;  %v1143_v36 = vpop.permute.xlu1 %1142  ;;  %v1140_v38 = vunpack.i.h.bf16 %v1138_v29 }
  0x93   : > { %994 = vmatprep.mubr.f32.mxu0 %v380_v20  ;;  %v1144_v40 = vunpack.i.l.bf16 %v1143_v36  ;;  %v1145_v44 = vunpack.i.h.bf16 %v1143_v36 }
  0x94   : > { %v386_v41 = vsel %vm373_vm0, %v289_v37, %v1139_v33  ;;  %v387_v45 = vsel %vm373_vm0, %v290_v42, %v1140_v38  ;;  %v878_v37 = vld [vmem:[%s1408_s5] ss:$0 sm:$0xff] }
  0x95   : > { %v388_v46 = vsel %vm373_vm0, %v291_v43, %v1144_v40  ;;  %v389_v48 = vsel %vm373_vm0, %v292_v47, %v1145_v44 }
  0x96   : > { %995 = vmatmul.mubr.f32.gmra.mrb[6].mxu0 %v381_v25 }
  0x97   : > { %997 = vmatprep.mubr.f32.mxu0 %v382_v27 }
  0x9a   : > { %998 = vmatmul.mubr.f32.gmra.mrb[8].mxu0 %v383_v32 }
  0x9b   : > { %1000 = vmatprep.mubr.f32.mxu0 %v384_v34 }
  0x9e   : > { %1001 = vmatmul.mubr.f32.gmra.mrb[10].mxu0 %v385_v39 }
  0x9f   : > { %1003 = vmatprep.mubr.f32.mxu0 %v386_v41 }
  0xa2   : > { %1004 = vmatmul.mubr.f32.gmra.mrb[12].mxu0 %v387_v45 }
  0xa3   : > { %1006 = vmatprep.mubr.f32.mxu0 %v388_v46 }
  0xa6   : > { %1007 = vmatmul.mubr.f32.gmra.mrb[14].mxu0 %v389_v48 }
 0x15d   : > { %v987_v53 = vpop.f32.mrb[0].mxu0 }
 0x15e   : > { %v485_v54 = vadd.f32 %v987_v53, %v877_v52  ;;  %v479_v55 = vpop.f32.mrb[1].mxu0 }
 0x15f   : > { %v480_v56 = vadd.f32 %v877_v52, %v479_v55 }
 0x160   : > { %v559_v59 = vmax.f32 %v485_v54, 0.0 }
 0x161   : > { %v558_v57 = vmax.f32 %v480_v56, 0.0  ;;  %v990_v58 = vpop.f32.mrb[2].mxu0 }
 0x162   : > { %v495_v60 = vadd.f32 %v990_v58, %v877_v52  ;;  %v489_v61 = vpop.f32.mrb[3].mxu0 }
 0x163   : > { %v490_v62 = vadd.f32 %v877_v52, %v489_v61  ;;  %1025 = vmatprep.mubr.msk.f32.mxu1 %vm373_vm0, %v558_v57 }
 0x164   : > { %1026 = vmatmul.mubr.msk.f32.vlgmr.msra.gmra.mrb[0].mxu1 %vm373_vm0, %v559_v59  ;;  %v561_v1 = vmax.f32 %v495_v60, 0.0 }
 0x165   : > { %v560_v63 = vmax.f32 %v490_v62, 0.0  ;;  %v993_v0 = vpop.f32.mrb[4].mxu0 }
 0x166   : > { %v505_v2 = vadd.f32 %v993_v0, %v877_v52  ;;  %v499_v3 = vpop.f32.mrb[5].mxu0 }
 0x167   : > { %v500_v4 = vadd.f32 %v877_v52, %v499_v3  ;;  %1028 = vmatprep.mubr.msk.f32.mxu1 %vm373_vm0, %v560_v63 }
 0x168   : > { %1029 = vmatmul.mubr.msk.f32.gmra.mrb[2].mxu1 %vm373_vm0, %v561_v1  ;;  %v563_v7 = vmax.f32 %v505_v2, 0.0 }
 0x169   : > { %v562_v5 = vmax.f32 %v500_v4, 0.0  ;;  %v996_v6 = vpop.f32.mrb[6].mxu0 }
 0x16a   : > { %v515_v8 = vadd.f32 %v996_v6, %v877_v52  ;;  %v509_v9 = vpop.f32.mrb[7].mxu0 }
 0x16b   : > { %v510_v10 = vadd.f32 %v877_v52, %v509_v9  ;;  %1031 = vmatprep.mubr.msk.f32.mxu1 %vm373_vm0, %v562_v5 }
 0x16c   : > { %1032 = vmatmul.mubr.msk.f32.gmra.mrb[4].mxu1 %vm373_vm0, %v563_v7  ;;  %v565_v13 = vmax.f32 %v515_v8, 0.0 }
 0x16d   : > { %v564_v11 = vmax.f32 %v510_v10, 0.0  ;;  %v999_v12 = vpop.f32.mrb[8].mxu0 }
 0x16e   : > { %v525_v14 = vadd.f32 %v999_v12, %v877_v52  ;;  %v519_v15 = vpop.f32.mrb[9].mxu0 }
 0x16f   : > { %v520_v16 = vadd.f32 %v877_v52, %v519_v15  ;;  %1034 = vmatprep.mubr.msk.f32.mxu1 %vm373_vm0, %v564_v11 }
 0x170   : > { %1035 = vmatmul.mubr.msk.f32.gmra.mrb[6].mxu1 %vm373_vm0, %v565_v13  ;;  %v567_v19 = vmax.f32 %v525_v14, 0.0 }
 0x171   : > { %v566_v17 = vmax.f32 %v520_v16, 0.0  ;;  %v1002_v18 = vpop.f32.mrb[10].mxu0 }
 0x172   : > { %v535_v20 = vadd.f32 %v1002_v18, %v877_v52  ;;  %v529_v21 = vpop.f32.mrb[11].mxu0 }
 0x173   : > { %v530_v22 = vadd.f32 %v877_v52, %v529_v21  ;;  %1037 = vmatprep.mubr.msk.f32.mxu1 %vm373_vm0, %v566_v17 }
 0x174   : > { %1038 = vmatmul.mubr.msk.f32.gmra.mrb[8].mxu1 %vm373_vm0, %v567_v19  ;;  %v569_v25 = vmax.f32 %v535_v20, 0.0 }
 0x175   : > { %v568_v23 = vmax.f32 %v530_v22, 0.0  ;;  %v1005_v24 = vpop.f32.mrb[12].mxu0 }
 0x176   : > { %v545_v26 = vadd.f32 %v1005_v24, %v877_v52  ;;  %v539_v27 = vpop.f32.mrb[13].mxu0 }
 0x177   : > { %v540_v28 = vadd.f32 %v877_v52, %v539_v27  ;;  %1040 = vmatprep.mubr.msk.f32.mxu1 %vm373_vm0, %v568_v23 }
 0x178   : > { %1041 = vmatmul.mubr.msk.f32.gmra.mrb[10].mxu1 %vm373_vm0, %v569_v25  ;;  %v571_v31 = vmax.f32 %v545_v26, 0.0 }
 0x179   : > { %v570_v29 = vmax.f32 %v540_v28, 0.0  ;;  %v1008_v30 = vpop.f32.mrb[14].mxu0 }
 0x17a   : > { %v555_v32 = vadd.f32 %v1008_v30, %v877_v52  ;;  %v549_v33 = vpop.f32.mrb[15].mxu0 }
 0x17b   : > { %v550_v34 = vadd.f32 %v877_v52, %v549_v33  ;;  %1043 = vmatprep.mubr.msk.f32.mxu1 %vm373_vm0, %v570_v29 }
 0x17c   : > { %1044 = vmatmul.mubr.msk.f32.gmra.mrb[12].mxu1 %vm373_vm0, %v571_v31  ;;  %v573_v36 = vmax.f32 %v555_v32, 0.0 }
 0x17d   : > { %v572_v35 = vmax.f32 %v550_v34, 0.0 }
 0x17f   : > { %1046 = vmatprep.mubr.msk.f32.mxu1 %vm373_vm0, %v572_v35 }
 0x180   : > { %1047 = vmatmul.mubr.msk.f32.gmra.mrb[14].mxu1 %vm373_vm0, %v573_v36 }
 0x237   : > { %v1027_v38 = vpop.f32.mrb[0].mxu1 }
 0x238   : > { %v709_v39 = vadd.f32 %v1027_v38, %v878_v37  ;;  %v703_v40 = vpop.f32.mrb[1].mxu1 }
 0x239   : > { %v704_v41 = vadd.f32 %v878_v37, %v703_v40 }
 0x23a   : > { %783 = vst.msk [vmem:[%s1366_s18 + $0x8] sm:$0xff] %vm373_vm0, %v709_v39 }
 0x23b   : > { %782 = vst.msk [vmem:[%s1366_s18] sm:$0xff] %vm373_vm0, %v704_v41  ;;  %v1030_v42 = vpop.f32.mrb[2].mxu1 }
 0x23c   : > { %v719_v43 = vadd.f32 %v1030_v42, %v878_v37  ;;  %v713_v44 = vpop.f32.mrb[3].mxu1 }
 0x23d   : > { %v714_v45 = vadd.f32 %v878_v37, %v713_v44 }
 0x23e   : > { %785 = vst.msk [vmem:[%s1366_s18 + $0x18] sm:$0xff] %vm373_vm0, %v719_v43 }
 0x23f   : > { %784 = vst.msk [vmem:[%s1366_s18 + $0x10] sm:$0xff] %vm373_vm0, %v714_v45  ;;  %v1033_v46 = vpop.f32.mrb[4].mxu1 }
 0x240   : > { %v729_v47 = vadd.f32 %v1033_v46, %v878_v37  ;;  %v723_v48 = vpop.f32.mrb[5].mxu1 }
 0x241   : > { %v724_v49 = vadd.f32 %v878_v37, %v723_v48 }
 0x242   : > { %787 = vst.msk [vmem:[%s1366_s18 + $0x28] sm:$0xff] %vm373_vm0, %v729_v47 }
 0x243   : > { %786 = vst.msk [vmem:[%s1366_s18 + $0x20] sm:$0xff] %vm373_vm0, %v724_v49  ;;  %v1036_v50 = vpop.f32.mrb[6].mxu1 }
 0x244   : > { %v739_v51 = vadd.f32 %v1036_v50, %v878_v37  ;;  %v733_v52 = vpop.f32.mrb[7].mxu1 }
 0x245   : > { %v734_v53 = vadd.f32 %v878_v37, %v733_v52 }
 0x246   : > { %789 = vst.msk [vmem:[%s1366_s18 + $0x38] sm:$0xff] %vm373_vm0, %v739_v51 }
 0x247   : > { %788 = vst.msk [vmem:[%s1366_s18 + $0x30] sm:$0xff] %vm373_vm0, %v734_v53  ;;  %v1039_v54 = vpop.f32.mrb[8].mxu1 }
 0x248   : > { %v749_v55 = vadd.f32 %v1039_v54, %v878_v37  ;;  %v743_v56 = vpop.f32.mrb[9].mxu1 }
 0x249   : > { %v744_v57 = vadd.f32 %v878_v37, %v743_v56 }
 0x24a   : > { %791 = vst.msk [vmem:[%s1366_s18 + $0x48] sm:$0xff] %vm373_vm0, %v749_v55 }
 0x24b   : > { %790 = vst.msk [vmem:[%s1366_s18 + $0x40] sm:$0xff] %vm373_vm0, %v744_v57  ;;  %v1042_v58 = vpop.f32.mrb[10].mxu1 }
 0x24c   : > { %v759_v59 = vadd.f32 %v1042_v58, %v878_v37  ;;  %v753_v60 = vpop.f32.mrb[11].mxu1 }
 0x24d   : > { %v754_v61 = vadd.f32 %v878_v37, %v753_v60 }
 0x24e   : > { %793 = vst.msk [vmem:[%s1366_s18 + $0x58] sm:$0xff] %vm373_vm0, %v759_v59 }
 0x24f   : > { %792 = vst.msk [vmem:[%s1366_s18 + $0x50] sm:$0xff] %vm373_vm0, %v754_v61  ;;  %v1045_v62 = vpop.f32.mrb[12].mxu1 }
 0x250   : > { %v769_v63 = vadd.f32 %v1045_v62, %v878_v37  ;;  %v763_v0 = vpop.f32.mrb[13].mxu1 }
 0x251   : > { %v764_v1 = vadd.f32 %v878_v37, %v763_v0 }
 0x252   : > { %795 = vst.msk [vmem:[%s1366_s18 + $0x68] sm:$0xff] %vm373_vm0, %v769_v63 }
 0x253   : > { %794 = vst.msk [vmem:[%s1366_s18 + $0x60] sm:$0xff] %vm373_vm0, %v764_v1  ;;  %v1048_v2 = vpop.f32.mrb[14].mxu1 }
 0x254   : > { %v779_v3 = vadd.f32 %v1048_v2, %v878_v37  ;;  %v773_v4 = vpop.f32.mrb[15].mxu1 }
 0x255   : > { %v774_v5 = vadd.f32 %v878_v37, %v773_v4 }
 0x256   : > { %797 = vst.msk [vmem:[%s1366_s18 + $0x78] sm:$0xff] %vm373_vm0, %v779_v3 }
 0x257   : > { %796 = vst.msk [vmem:[%s1366_s18 + $0x70] sm:$0xff] %vm373_vm0, %v774_v5 }
 0x258 PF: > { %s16_s21 = sadd.s32 1, %s1152_s21  }
 0x259   : > { %p13_p4 = scmp.ge.s32.totalorder %s16_s21, 4  }
 0x25b   :  { %15 = sbr.rel (!%p13_p4) target bundleno = 1 (0x1), region = 77 }

</bundles_post_ra>
